<compile_context>
chip_gen: v5e
topology: v5e:2x2
jax: 0.10.0
libtpu: 0.0.40
codegen_flags: <defaults>
</compile_context>

<pallas_src>
import functools

import jax
import jax.numpy as jnp
import numpy as np
from jax.experimental import pallas as pl
from jax.experimental.pallas import tpu as pltpu


def _round_up(x, m):
    return ((x + m - 1) // m) * m


def _g_loss_partials_kernel(feat_ref, logits_ref, label_ref,
                            colsum_ref, colsq_ref, ce_ref, *,
                            batch, needs_mask):
    tb, _ = feat_ref.shape
    c = logits_ref.shape[1]

    feat = feat_ref[...].astype(jnp.float32)      # (TB, D)
    logits = logits_ref[...].astype(jnp.float32)  # (TB, C)
    label = label_ref[...]                        # (TB, 1) int32

    if needs_mask:  # statically elided when B % tb == 0
        row_ids = (pl.program_id(0) * tb
                   + jax.lax.broadcasted_iota(jnp.int32, (tb, 1), 0))
        valid = row_ids < batch                   # (TB, 1) bool
        feat = jnp.where(valid, feat, 0.0)
        logits = jnp.where(valid, logits, 0.0)
        validf = valid.astype(jnp.float32)

    # ---- feature partials for the Frobenius distance (expanded form) ----
    f3 = feat[None]                               # (1, TB, D)
    colsum_ref[...] = jnp.sum(f3, axis=1, keepdims=True)        # (1, 1, D)
    colsq_ref[...] = jnp.sum(f3 * f3, axis=1, keepdims=True)    # (1, 1, D)

    # ---- cross-entropy partials (no (TB, C) log-softmax temporary, no one-hot) ----
    m = jnp.max(logits, axis=1, keepdims=True)                              # (TB, 1)
    lse = jnp.log(jnp.sum(jnp.exp(logits - m), axis=1, keepdims=True)) + m  # (TB, 1)
    col = jax.lax.broadcasted_iota(jnp.int32, (tb, c), 1)
    picked = jnp.sum(jnp.where(col == label, logits, 0.0),
                     axis=1, keepdims=True)                                 # (TB, 1)
    row_ce = lse - picked
    if needs_mask:
        row_ce = row_ce * validf
    ce_part = jnp.sum(row_ce)                     # scalar for this block
    ce_ref[...] = jnp.broadcast_to(ce_part, ce_ref.shape).astype(jnp.float32)


def g_loss(deep_feat, classification, label, n, w, *,
           target_block_bytes=8 * 1024 * 1024):
    """Pallas implementation of G_Loss.forward (scalar f32 loss)."""
    deep_feat = jnp.asarray(deep_feat)            # f32 or bf16, upcast in-kernel
    classification = jnp.asarray(classification)
    B, D = deep_feat.shape
    _, C = classification.shape

    n_f = jnp.asarray(n, jnp.float32)             # (K, D)
    w_f = jnp.asarray(w, jnp.float32).reshape(-1) # (K,)
    label2 = jnp.asarray(label, jnp.int32).reshape(B, 1)

    # ---- batch-tile sizing from the VMEM budget (no artificial row cap) ----
    feat_item = deep_feat.dtype.itemsize
    logit_item = classification.dtype.itemsize
    gran = max(8, 32 // min(feat_item, logit_item))   # sublane granularity
    # True per-row VMEM footprint of the streamed blocks; the (tb,1) int32 label tile
    # pads to 128 lanes -> 512 B/row.
    row_bytes = D * feat_item + C * logit_item + 128 * 4
    tb = target_block_bytes // max(row_bytes, 1)      # single buffer; runtime double-buffers
    tb = max(gran, (tb // gran) * gran)
    tb = min(tb, _round_up(B, gran))

    grid_n = pl.cdiv(B, tb)
    needs_mask = (B % tb) != 0

    kernel = functools.partial(_g_loss_partials_kernel,
                               batch=B, needs_mask=needs_mask)

    cost = pl.CostEstimate(
        flops=3 * B * D + 7 * B * C,
        transcendentals=B * C + B,
        bytes_accessed=(deep_feat.size * feat_item
                        + classification.size * logit_item
                        + B * 4 + grid_n * (2 * D + 128) * 4),
    )

    colsum_p, colsq_p, ce_p = pl.pallas_call(
        kernel,
        out_shape=(
            jax.ShapeDtypeStruct((grid_n, 1, D), jnp.float32),    # per-block col sums
            jax.ShapeDtypeStruct((grid_n, 1, D), jnp.float32),    # per-block col sq sums
            jax.ShapeDtypeStruct((grid_n, 1, 128), jnp.float32),  # per-block CE partial
        ),
        grid=(grid_n,),
        in_specs=[
            pl.BlockSpec((tb, D), lambda i: (i, 0)),   # deep_feat (streamed)
            pl.BlockSpec((tb, C), lambda i: (i, 0)),   # logits    (streamed)
            pl.BlockSpec((tb, 1), lambda i: (i, 0)),   # labels    (streamed)
        ],
        out_specs=(
            pl.BlockSpec((1, 1, D), lambda i: (i, 0, 0)),
            pl.BlockSpec((1, 1, D), lambda i: (i, 0, 0)),
            pl.BlockSpec((1, 1, 128), lambda i: (i, 0, 0)),
        ),
        compiler_params=pltpu.CompilerParams(
            dimension_semantics=("parallel",),         # no carried state -> both TCs on v7x
            vmem_limit_bytes=48 * 1024 * 1024,
        ),
        cost_estimate=cost,
    )(deep_feat, classification, label2)

    # ---- tiny cross-block reduce + prototype/rho finalize in plain JAX ----
    colsum = jnp.sum(colsum_p[:, 0, :], axis=0)        # (D,)
    featsq = jnp.sum(colsq_p)                          # sum ||f_i||^2
    ce = jnp.sum(ce_p[:, 0, 0]) / jnp.float32(B)       # mean CE

    proto_sq = jnp.sum(n_f * n_f, axis=1)              # (K,)
    cross = colsum @ n_f.T                             # (K,)
    dist2 = featsq + jnp.float32(B) * proto_sq - 2.0 * cross
    dist = jnp.sqrt(jnp.maximum(dist2, 0.0))
    rho = jax.nn.softmax(-w_f * dist)
    rho_sum = jnp.sum(rho)                             # == 1; kept for module fidelity
    return rho_sum * ce


def g_loss_ref(deep_feat, classification, label, n, w):
    """Pure-JAX reference mirroring the PyTorch module."""
    dists = jnp.sqrt(jnp.sum((deep_feat[None, :, :] - n[:, None, :]) ** 2, axis=(1, 2)))
    rho = jnp.exp(-w * dists)
    rho = rho / jnp.sum(rho)
    logsm = jax.nn.log_softmax(classification, axis=-1)
    ce = -jnp.mean(logsm[jnp.arange(classification.shape[0]), label])
    return jnp.sum(rho) * ce


if __name__ == "__main__":
    key = jax.random.PRNGKey(0)
    kf, kc, kl, kn, kw = jax.random.split(key, 5)

    B, D, C, K = 2, 32, 8, 4
    deep_feat = jax.random.normal(kf, (B, D), jnp.float32)
    classification = jax.random.normal(kc, (B, C), jnp.float32)
    label = jax.random.randint(kl, (B,), 0, C, jnp.int32)
    n = jax.random.normal(kn, (K, D), jnp.float32)            # K prototype vectors
    w = jax.random.uniform(kw, (K,), jnp.float32, 0.1, 1.0)   # per-prototype weights

    loss = g_loss(deep_feat, classification, label, n, w)
    jax.block_until_ready(loss)

    ref = g_loss_ref(deep_feat, classification, label, n, w)
    np.testing.assert_allclose(np.asarray(loss), np.asarray(ref), rtol=1e-5, atol=1e-5)

    print("KERNEL_OK")
</pallas_src>

<mosaic_0001>
module attributes {stable_mosaic.version = 11 : i64} {
  func.func @_g_loss_partials_kernel(%arg0: i32, %arg1: memref<8x32xf32, #tpu.memory_space<vmem>>, %arg2: memref<8x8xf32, #tpu.memory_space<vmem>>, %arg3: memref<8x1xi32, #tpu.memory_space<vmem>>, %arg4: memref<1x1x32xf32, #tpu.memory_space<vmem>>, %arg5: memref<1x1x32xf32, #tpu.memory_space<vmem>>, %arg6: memref<1x1x128xf32, #tpu.memory_space<vmem>>) attributes {dimension_semantics = [#tpu.dimension_semantics<parallel>], iteration_bounds = array<i64: 1>, scalar_prefetch = 0 : i64, scratch_operands = 0 : i64, tpu.core_type = #tpu.core_type<tc>, window_params = [{transform_indices = @transform_0, window_bounds = array<i64: 8, 32>}, {transform_indices = @transform_1, window_bounds = array<i64: 8, 8>}, {transform_indices = @transform_2, window_bounds = array<i64: 8, 1>}, {transform_indices = @transform_3, window_bounds = array<i64: 1, 1, 32>}, {transform_indices = @transform_4, window_bounds = array<i64: 1, 1, 32>}, {transform_indices = @transform_5, window_bounds = array<i64: 1, 1, 128>}]} {
    %c0 = arith.constant 0 : index
    %c0_0 = arith.constant 0 : index
    %0 = vector.load %arg1[%c0, %c0_0] : memref<8x32xf32, #tpu.memory_space<vmem>>, vector<8x32xf32>
    %c0_1 = arith.constant 0 : index
    %c0_2 = arith.constant 0 : index
    %1 = vector.load %arg2[%c0_1, %c0_2] : memref<8x8xf32, #tpu.memory_space<vmem>>, vector<8x8xf32>
    %c0_3 = arith.constant 0 : index
    %c0_4 = arith.constant 0 : index
    %2 = vector.load %arg3[%c0_3, %c0_4] : memref<8x1xi32, #tpu.memory_space<vmem>>, vector<8x1xi32>
    %c8_i32 = arith.constant 8 : i32
    %3 = arith.muli %arg0, %c8_i32 : i32
    %4 = tpu.iota {dimensions = array<i32: 0>} : vector<8x1xi32>
    %5 = vector.broadcast %3 : i32 to vector<8x1xi32>
    %6 = arith.addi %5, %4 : vector<8x1xi32>
    %c2_i32 = arith.constant 2 : i32
    %7 = vector.broadcast %c2_i32 : i32 to vector<8x1xi32>
    %8 = arith.cmpi slt, %6, %7 : vector<8x1xi32>
    %cst = arith.constant 0.000000e+00 : f32
    %9 = vector.shape_cast %8 : vector<8x1xi1> to vector<8x1xi1>
    %10 = vector.broadcast %9 : vector<8x1xi1> to vector<8x32xi1>
    %11 = vector.broadcast %cst : f32 to vector<8x32xf32>
    %12 = arith.select %10, %0, %11 : vector<8x32xi1>, vector<8x32xf32>
    %cst_5 = arith.constant 0.000000e+00 : f32
    %13 = vector.shape_cast %8 : vector<8x1xi1> to vector<8x1xi1>
    %14 = vector.broadcast %13 : vector<8x1xi1> to vector<8x8xi1>
    %15 = vector.broadcast %cst_5 : f32 to vector<8x8xf32>
    %16 = arith.select %14, %1, %15 : vector<8x8xi1>, vector<8x8xf32>
    %17 = arith.extui %8 : vector<8x1xi1> to vector<8x1xi32>
    %18 = arith.sitofp %17 : vector<8x1xi32> to vector<8x1xf32>
    %19 = vector.shape_cast %12 : vector<8x32xf32> to vector<1x8x32xf32>
    %cst_6 = arith.constant dense<0.000000e+00> : vector<1x32xf32>
    %20 = vector.multi_reduction <add>, %19, %cst_6 [1] : vector<1x8x32xf32> to vector<1x32xf32>
    %21 = vector.shape_cast %20 : vector<1x32xf32> to vector<1x1x32xf32>
    %c0_7 = arith.constant 0 : index
    %c0_8 = arith.constant 0 : index
    %c0_9 = arith.constant 0 : index
    %22 = vector.load %arg4[%c0_7, %c0_8, %c0_9] : memref<1x1x32xf32, #tpu.memory_space<vmem>>, vector<1x1x32xf32>
    tpu.vector_store %arg4[%c0_7, %c0_8, %c0_9], %21 {strides = array<i32>} : memref<1x1x32xf32, #tpu.memory_space<vmem>>, vector<1x1x32xf32>,
    %23 = arith.mulf %19, %19 : vector<1x8x32xf32>
    %cst_10 = arith.constant dense<0.000000e+00> : vector<1x32xf32>
    %24 = vector.multi_reduction <add>, %23, %cst_10 [1] : vector<1x8x32xf32> to vector<1x32xf32>
    %25 = vector.shape_cast %24 : vector<1x32xf32> to vector<1x1x32xf32>
    %c0_11 = arith.constant 0 : index
    %c0_12 = arith.constant 0 : index
    %c0_13 = arith.constant 0 : index
    %26 = vector.load %arg5[%c0_11, %c0_12, %c0_13] : memref<1x1x32xf32, #tpu.memory_space<vmem>>, vector<1x1x32xf32>
    tpu.vector_store %arg5[%c0_11, %c0_12, %c0_13], %25 {strides = array<i32>} : memref<1x1x32xf32, #tpu.memory_space<vmem>>, vector<1x1x32xf32>,
    %cst_14 = arith.constant dense<0xFF800000> : vector<8xf32>
    %27 = vector.multi_reduction <maximumf>, %16, %cst_14 [1] : vector<8x8xf32> to vector<8xf32>
    %28 = vector.shape_cast %27 : vector<8xf32> to vector<8x1xf32>
    %29 = vector.broadcast %28 : vector<8x1xf32> to vector<8x8xf32>
    %30 = arith.subf %16, %29 : vector<8x8xf32>
    %31 = math.exp %30 : vector<8x8xf32>
    %cst_15 = arith.constant dense<0.000000e+00> : vector<8xf32>
    %32 = vector.multi_reduction <add>, %31, %cst_15 [1] : vector<8x8xf32> to vector<8xf32>
    %33 = vector.shape_cast %32 : vector<8xf32> to vector<8x1xf32>
    %34 = math.log %33 : vector<8x1xf32>
    %35 = arith.addf %34, %28 : vector<8x1xf32>
    %36 = tpu.iota {dimensions = array<i32: 1>} : vector<8x8xi32>
    %37 = vector.broadcast %2 : vector<8x1xi32> to vector<8x8xi32>
    %38 = arith.cmpi eq, %36, %37 : vector<8x8xi32>
    %cst_16 = arith.constant 0.000000e+00 : f32
    %39 = vector.broadcast %cst_16 : f32 to vector<8x8xf32>
    %40 = arith.select %38, %16, %39 : vector<8x8xi1>, vector<8x8xf32>
    %cst_17 = arith.constant dense<0.000000e+00> : vector<8xf32>
    %41 = vector.multi_reduction <add>, %40, %cst_17 [1] : vector<8x8xf32> to vector<8xf32>
    %42 = vector.shape_cast %41 : vector<8xf32> to vector<8x1xf32>
    %43 = arith.subf %35, %42 : vector<8x1xf32>
    %44 = arith.mulf %43, %18 : vector<8x1xf32>
    %45 = vector.shape_cast %44 : vector<8x1xf32> to vector<1x8x1xf32>
    %cst_18 = arith.constant dense<0.000000e+00> : vector<1xf32>
    %46 = vector.multi_reduction <add>, %45, %cst_18 [1, 2] : vector<1x8x1xf32> to vector<1xf32>
    %47 = vector.shape_cast %46 : vector<1xf32> to vector<1x1x1xf32>
    %48 = vector.extract %47[0, 0, 0] : f32 from vector<1x1x1xf32>
    %49 = vector.broadcast %48 : f32 to vector<1x1x128xf32>
    %c0_19 = arith.constant 0 : index
    %c0_20 = arith.constant 0 : index
    %c0_21 = arith.constant 0 : index
    %50 = vector.load %arg6[%c0_19, %c0_20, %c0_21] : memref<1x1x128xf32, #tpu.memory_space<vmem>>, vector<1x1x128xf32>
    tpu.vector_store %arg6[%c0_19, %c0_20, %c0_21], %49 {strides = array<i32>} : memref<1x1x128xf32, #tpu.memory_space<vmem>>, vector<1x1x128xf32>,
    return
  }
  func.func @transform_0(%arg0: i32) -> (i32, i32) {
    %c0_i32 = arith.constant 0 : i32
    %c0_i32_0 = arith.constant 0 : i32
    return %arg0, %c0_i32 : i32, i32
  }
  func.func @transform_1(%arg0: i32) -> (i32, i32) {
    %c0_i32 = arith.constant 0 : i32
    %c0_i32_0 = arith.constant 0 : i32
    return %arg0, %c0_i32 : i32, i32
  }
  func.func @transform_2(%arg0: i32) -> (i32, i32) {
    %c0_i32 = arith.constant 0 : i32
    %c0_i32_0 = arith.constant 0 : i32
    return %arg0, %c0_i32 : i32, i32
  }
  func.func @transform_3(%arg0: i32) -> (i32, i32, i32) {
    %c0_i32 = arith.constant 0 : i32
    %c0_i32_0 = arith.constant 0 : i32
    %c0_i32_1 = arith.constant 0 : i32
    return %arg0, %c0_i32, %c0_i32_0 : i32, i32, i32
  }
  func.func @transform_4(%arg0: i32) -> (i32, i32, i32) {
    %c0_i32 = arith.constant 0 : i32
    %c0_i32_0 = arith.constant 0 : i32
    %c0_i32_1 = arith.constant 0 : i32
    return %arg0, %c0_i32, %c0_i32_0 : i32, i32, i32
  }
  func.func @transform_5(%arg0: i32) -> (i32, i32, i32) {
    %c0_i32 = arith.constant 0 : i32
    %c0_i32_0 = arith.constant 0 : i32
    %c0_i32_1 = arith.constant 0 : i32
    return %arg0, %c0_i32, %c0_i32_0 : i32, i32, i32
  }
}

</mosaic_0001>

<bundles_post_ra>
// kernel: tpu_custom_call.1
= control target key start
LH: loop header
LB: loop body
LE: loop exit
PB: predicated region body
PF: predicated region fallthrough
CT: control target
= control target key end

     0   :  { %11 = vsyncpa [#allocation3], 0  ;;  %s334_s0 = inlined_call_operand.vmem [shape: f32[2,32], index: 0, kind: input, shape index: {}]   ;;  %s335_s1 = inlined_call_operand.hbm [shape: f32[2,8], index: 1, kind: input, shape index: {}]   ;;  %s336_s2 = inlined_call_operand.vmem [shape: s32[2,1], index: 2, kind: input, shape index: {}]   ;;  %s337_s3 = inlined_call_operand.hbm [shape: f32[1,1,32], index: 3, kind: output, shape index: {0}]   ;;  %s338_s4 = inlined_call_operand.hbm [shape: f32[1,1,32], index: 4, kind: output, shape index: {1}]   ;;  %s339_s5 = inlined_call_operand.hbm [shape: f32[1,1,128], index: 5, kind: output, shape index: {2}]  }
   0x1   :  { %12 = vsyncpa [#allocation4], 0 }
   0x2   :  { %13 = vsyncpa [#allocation7], 0 }
   0x3   :  { %19 = vsyncadd [#allocation3], 96  ;;  %s20_s20 = sshll.u32 %s335_s1, 4  ;;  %s272_s21 = smov [#allocation2]   ;;  %s21_s20 = int_to_ptr.hbm [resolvable:$true] %s20_s20 }
   0x4   :  { %s22_s22 = sshll.u32 %s272_s21, 4  ;;  %s273_s23 = smov 32   ;;  %s23_s22 = int_to_ptr.vmem [resolvable:$true] %s22_s22 }
   0x5   :  { %s274_s24 = smov 2  }
   0x6   :  { %28 = dma.hbm_to_vmem [thread:$0]  %s21_s20, 32, %s23_s22, [#allocation3], %s273_s23, %s273_s23, %s274_s24  }
   0x7   :  { %266 = dma.done.wait [#allocation3], 128  }
   0x8   :  { %267 = vsyncadd [#allocation3], 4294967168  ;;  %v39_v0 = vlaneseq  ;;  %v275_v1 = vmov 0   ;;  %vm68_vm1 = vcmask 64512   ;;  %v36_v3 = vld [vmem:[#allocation2] sm:$0xff]  ;;  %v276_v21 = vmov 0.0  }
   0x9   :  { %165 = vset.pattern.permute.xlu0 %v275_v1  ;;  %v37_v6 = vld [vmem:[%s336_s2] sm:$0xff]  ;;  %vm93_vm3 = vcmask 7168   ;;  %vm49_vm4 = vcmask 261120   ;;  %s124_s30 = sshll.u32 %s338_s4, 4  ;;  %s278_s6 = smov [#allocation5]   ;;  %vm57_vm5 = vcmask 253952   ;;  %s125_s30 = int_to_ptr.hbm [resolvable:$true] %s124_s30 }
   0xa   :  { %v40_v2 = vshrl.u32 %v39_v0, 7  ;;  %v82_v12 = vand.u32 127, %v39_v0  ;;  %v35_v28 = vld [vmem:[%s334_s0] sm:$0xff]  ;;  %s277_s0 = smov [#allocation6]   ;;  %s111_s7 = sshll.u32 %s278_s6, 4  ;;  %s112_s7 = int_to_ptr.vmem [resolvable:$true] %s111_s7 }
   0xb   :  { %s122_s27 = sshll.u32 %s277_s0, 4  ;;  %s113_s10 = sshll.u32 %s337_s3, 4  ;;  %s123_s27 = int_to_ptr.vmem [resolvable:$true] %s122_s27  ;;  %s114_s10 = int_to_ptr.hbm [resolvable:$true] %s113_s10 }
   0xc   :  { %vm43_vm0 = vcmp.lt.s32.totalorder %v40_v2, 2  ;;  %s279_s4 = smov [#allocation8]   ;;  %s135_s14 = sshll.u32 %s339_s5, 4  ;;  %s136_s14 = int_to_ptr.hbm [resolvable:$true] %s135_s14 }
   0xd   :  { %v47_v4 = vsel %vm43_vm0, %v36_v3, 0.0  ;;  %v154_v22 = vsel %vm43_vm0, 1.0, %v276_v21  ;;  %v46_v30 = vsel %vm43_vm0, %v35_v28, 0.0  ;;  %s133_s11 = sshll.u32 %s279_s4, 4  ;;  %s134_s11 = int_to_ptr.vmem [resolvable:$true] %s133_s11 }
   0xe   :  { %v69_v5 = vsel %vm68_vm1, %v47_v4, -inf  ;;  %v59_v33 = vmul.f32 %v46_v30, %v46_v30  ;;  %v50_v35 = vsel %vm49_vm4, %v46_v30, 0.0 }
   0xf   :  { %70 = vmax.xlane.f32.xlu0 %v69_v5  ;;  %v51_v38 = vrot.slane %v50_v35, 4 }
  0x10   :  { %v60_v37 = vsel %vm49_vm4, %v59_v33, 0.0 }
  0x11   :  { %v61_v39 = vrot.slane %v60_v37, 4  ;;  %v52_v40 = vadd.f32 %v51_v38, %v50_v35 }
  0x13   :  { %v62_v41 = vadd.f32 %v61_v39, %v60_v37  ;;  %v53_v42 = vrot.slane %v52_v40, 2 }
  0x15   :  { %v63_v43 = vrot.slane %v62_v41, 2  ;;  %v54_v45 = vadd.f32 %v53_v42, %v52_v40 }
  0x17   :  { %v64_v44 = vadd.f32 %v63_v43, %v62_v41  ;;  %v55_v47 = vrot.slane %v54_v45, 1 }
  0x19   :  { %v65_v46 = vrot.slane %v64_v44, 1  ;;  %v56_v49 = vadd.f32 %v55_v47, %v54_v45 }
  0x1b   :  { %v66_v48 = vadd.f32 %v65_v46, %v64_v44  ;;  %58 = vst.msk [vmem:[#allocation5] sm:$0x1] %vm57_vm5, %v56_v49 }
  0x1c   :  { %116 = dma.vmem_to_hbm [thread:$0]  %s112_s7, 16, %s114_s10, [#allocation4]  }
  0x1d   :  { %67 = vst.msk [vmem:[#allocation6] sm:$0x1] %vm57_vm5, %v66_v48 }
  0x1e   :  { %127 = dma.vmem_to_hbm [thread:$0]  %s123_s27, 16, %s125_s30, [#allocation7]  }
  0x23   :  { %84 = vperm.xlu0 %165, %v37_v6  }
  0x82   :  { %v71_v7 = vpop.xlane.xlu0 %70 }
  0x83   :  { %v72_v8 = vsub.f32 %v47_v4, %v71_v7 }
  0x85   :  { %v73_v9 = vmul.f32 1.442695, %v72_v8 }
  0x87   :  { %166 = vpow2.f32 %v73_v9 }
  0x8d   :  { %v167_v10 = vpop.eup %166 }
  0x8e   :  { %v75_v11 = vsel %vm68_vm1, %v167_v10, 0.0 }
  0x8f   :  { %76 = vadd.xlane.f32.xlu1 %v75_v11 }
  0x95   :  { %v85_v13 = vpop.permute.xlu0 %84 }
  0x96   :  { %vm86_vm2 = vcmp.eq.s32.totalorder %v82_v12, %v85_v13 }
  0x97   :  { %v87_v14 = vsel %vm86_vm2, %v47_v4, 0.0 }
  0x98   :  { %v88_v15 = vsel %vm68_vm1, %v87_v14, 0.0 }
  0x99   :  { %89 = vadd.xlane.f32.xlu1 %v88_v15 }
 0x102   :  { %v77_v16 = vpop.xlane.xlu1 %76 }
 0x103   :  { %168 = vlog2.f32 %v77_v16 }
 0x109   :  { %v169_v17 = vpop.eup %168 }
 0x10a   :  { %v79_v18 = vmul.f32 0.6931472, %v169_v17 }
 0x10c   :  { %v80_v19 = vadd.f32 %v79_v18, %v71_v7  ;;  %v90_v20 = vpop.xlane.xlu1 %89 }
 0x10e   :  { %v91_v23 = vsub.f32 %v80_v19, %v90_v20 }
 0x110   :  { %v92_v24 = vmul.f32 %v154_v22, %v91_v23 }
 0x112   :  { %v94_v25 = vsel %vm93_vm3, %v92_v24, 0.0 }
 0x113   :  { %95 = vadd.xlane.f32.xlu2 %v94_v25 }
 0x186   :  { %v96_v26 = vpop.xlane.xlu2 %95 }
 0x187   :  { %v97_v27 = vrot.slane %v96_v26, 4 }
 0x189   :  { %v98_v29 = vadd.f32 %v97_v27, %v96_v26 }
 0x18b   :  { %v99_v31 = vrot.slane %v98_v29, 2 }
 0x18d   :  { %v100_v32 = vadd.f32 %v99_v31, %v98_v29 }
 0x18f   :  { %v101_v34 = vrot.slane %v100_v32, 1 }
 0x191   :  { %v102_v36 = vadd.f32 %v101_v34, %v100_v32 }
 0x193   :  { %155 = vpush %v102_v36 }
 0x1c4   :  { %s156_s3 = spop %155 }
 0x1c5   :  { %v104_v50 = vstv %s156_s3 }
 0x1c6   :  { %105 = vst [vmem:[#allocation8] sm:$0x1] %v104_v50 }
 0x1c7   :  { %138 = dma.vmem_to_hbm [thread:$0]  %s134_s11, 16, %s136_s14, [#allocation7]  }
 0x1c8   :  { %268 = dma.done.wait [#allocation4], 16  }
 0x1c9   :  { %269 = vsyncadd [#allocation4], 4294967280 }
 0x1ca   :  { %270 = dma.done.wait [#allocation7], 32  }
 0x1cb   :  { %271 = vsyncadd [#allocation7], 4294967264 }
 0x1cc   :  { %151 = vsyncpa [#allocation3], 1 }
 0x1cd   :  { %152 = vsyncpa [#allocation4], 1 }
 0x1ce   :  { %153 = vsyncpa [#allocation7], 1 }

</bundles_post_ra>
